<compile_context>
chip_gen: v6e
topology: v6e:2x2x1
jax: 0.10.0
libtpu: 0.0.40
codegen_flags: <defaults>
</compile_context>

<pallas_src>
import functools
import math

import jax
import jax.numpy as jnp
from jax import lax
from jax.experimental import pallas as pl
from jax.experimental.pallas import tpu as pltpu

# Fits v7x (64 MiB physical / TC) and v5e/v6e (128 MiB).
VMEM_LIMIT_BYTES = 48 * 1024 * 1024


def _round_up(x, m):
    return ((x + m - 1) // m) * m


# --------------------------------------------------------------------------
# Linear: y = x @ W + b  (W stored as (in, out) == torch weight.T), fused ReLU
# --------------------------------------------------------------------------
def _linear_kernel(x_ref, w_ref, b_ref, o_ref, acc_ref, *, relu):
    @pl.when(pl.program_id(2) == 0)
    def _():
        acc_ref[...] = jnp.zeros_like(acc_ref)

    acc_ref[...] += jnp.dot(x_ref[...], w_ref[...],
                            preferred_element_type=jnp.float32)

    @pl.when(pl.program_id(2) == pl.num_programs(2) - 1)
    def _():
        y = acc_ref[...] + b_ref[...].astype(jnp.float32)
        if relu:
            y = jnp.maximum(y, 0.0)
        o_ref[...] = y.astype(o_ref.dtype)


def linear(x, w, b, *, relu=False, tm_cap=256, tn_cap=256, tk_cap=512):
    """x: (M, K); w: (K, N); b: (N,) -> (M, N)."""
    M, K = x.shape
    Kw, N = w.shape
    assert K == Kw
    tm = min(tm_cap, _round_up(M, 8))
    tk = min(tk_cap, _round_up(K, 128))
    tn = min(tn_cap, _round_up(N, 128))
    Mp, Kp, Np = _round_up(M, tm), _round_up(K, tk), _round_up(N, tn)

    xp = jnp.pad(x, ((0, Mp - M), (0, Kp - K)))
    wp = jnp.pad(w, ((0, Kp - K), (0, Np - N)))
    bp = jnp.pad(b, (0, Np - N)).reshape(1, Np)

    out = pl.pallas_call(
        functools.partial(_linear_kernel, relu=relu),
        out_shape=jax.ShapeDtypeStruct((Mp, Np), x.dtype),
        grid=(Mp // tm, Np // tn, Kp // tk),
        in_specs=[
            pl.BlockSpec((tm, tk), lambda i, j, k: (i, k)),
            pl.BlockSpec((tk, tn), lambda i, j, k: (k, j)),
            pl.BlockSpec((1, tn), lambda i, j, k: (0, j)),
        ],
        out_specs=pl.BlockSpec((tm, tn), lambda i, j, k: (i, j)),
        scratch_shapes=[pltpu.VMEM((tm, tn), jnp.float32)],
        compiler_params=pltpu.CompilerParams(
            dimension_semantics=("parallel", "parallel", "arbitrary"),
            vmem_limit_bytes=VMEM_LIMIT_BYTES,
        ),
    )(xp, wp, bp)
    return out[:M, :N]


# --------------------------------------------------------------------------
# Scaled dot-product attention, one (batch * head) per grid step
# --------------------------------------------------------------------------
def _attention_kernel(q_ref, k_ref, v_ref, m_ref, o_ref, *, scale):
    q = q_ref[0].astype(jnp.float32)          # (S, dk)
    k = k_ref[0].astype(jnp.float32)          # (S, dk)
    v = v_ref[0].astype(jnp.float32)          # (S, dk)

    s = jnp.dot(q, k.T, preferred_element_type=jnp.float32) * scale   # (S, S)
    s = jnp.where(m_ref[0] == 0.0, -jnp.inf, s)                       # torch masked_fill
    s = s - jnp.max(s, axis=-1, keepdims=True)
    p = jnp.exp(s)
    denom = jnp.sum(p, axis=-1, keepdims=True)
    p = p * pl.reciprocal(denom, approx=False)

    o_ref[0] = jnp.dot(p, v, preferred_element_type=jnp.float32).astype(o_ref.dtype)


def multi_head_attention(q, k, v, mask):
    """q, k, v: (B*H, S, dk); mask: (B*H, S, S) float (0 = masked)."""
    BH, S, dk = q.shape
    scale = 1.0 / math.sqrt(dk)
    return pl.pallas_call(
        functools.partial(_attention_kernel, scale=scale),
        out_shape=jax.ShapeDtypeStruct((BH, S, dk), q.dtype),
        grid=(BH,),
        in_specs=[
            pl.BlockSpec((1, S, dk), lambda i: (i, 0, 0)),
            pl.BlockSpec((1, S, dk), lambda i: (i, 0, 0)),
            pl.BlockSpec((1, S, dk), lambda i: (i, 0, 0)),
            pl.BlockSpec((1, S, S), lambda i: (i, 0, 0)),
        ],
        out_specs=pl.BlockSpec((1, S, dk), lambda i: (i, 0, 0)),
        compiler_params=pltpu.CompilerParams(
            dimension_semantics=("parallel",),
            vmem_limit_bytes=VMEM_LIMIT_BYTES,
        ),
    )(q, k, v, mask)


# --------------------------------------------------------------------------
# Fused residual add + nn.LayerNorm (biased variance, eps inside sqrt)
# --------------------------------------------------------------------------
def _add_layernorm_kernel(x_ref, r_ref, g_ref, b_ref, o_ref, *, eps, hidden):
    x = x_ref[...].astype(jnp.float32) + r_ref[...].astype(jnp.float32)
    inv_n = 1.0 / hidden
    s1 = jnp.sum(x, axis=-1, keepdims=True)          # independent XLU reductions
    s2 = jnp.sum(x * x, axis=-1, keepdims=True)
    mean = s1 * inv_n
    var = jnp.maximum(s2 * inv_n - mean * mean, 0.0)  # biased (nn.LayerNorm)
    inv_std = lax.rsqrt(var + eps)                    # EUP slot
    y = (x - mean) * inv_std * g_ref[...].astype(jnp.float32) \
        + b_ref[...].astype(jnp.float32)
    o_ref[...] = y.astype(o_ref.dtype)


def _pick_block_rows(rows, hidden, *, dtype_bytes=4, budget_bytes=12 << 20, cap=1024):
    # ~6 resident tiles of (block_rows, hidden): double-buffered x, residual, out.
    br = budget_bytes // max(1, 6 * hidden * dtype_bytes)
    br = max(8, min(cap, br, _round_up(rows, 8)))
    return max(8, (br // 8) * 8)


def add_layernorm(x, res, gamma, beta, *, eps=1e-5):
    """x, res: (rows, hidden); gamma, beta: (hidden,). Returns LN(x + res)."""
    rows, hidden = x.shape
    br = _pick_block_rows(rows, hidden)
    rows_p = _round_up(rows, br)
    xp = jnp.pad(x, ((0, rows_p - rows), (0, 0)))
    rp = jnp.pad(res, ((0, rows_p - rows), (0, 0)))
    g2 = gamma.reshape(1, hidden).astype(jnp.float32)
    b2 = beta.reshape(1, hidden).astype(jnp.float32)

    out = pl.pallas_call(
        functools.partial(_add_layernorm_kernel, eps=float(eps), hidden=hidden),
        out_shape=jax.ShapeDtypeStruct((rows_p, hidden), x.dtype),
        grid=(rows_p // br,),
        in_specs=[
            pl.BlockSpec((br, hidden), lambda i: (i, 0)),
            pl.BlockSpec((br, hidden), lambda i: (i, 0)),
            pl.BlockSpec((1, hidden), lambda i: (0, 0)),
            pl.BlockSpec((1, hidden), lambda i: (0, 0)),
        ],
        out_specs=pl.BlockSpec((br, hidden), lambda i: (i, 0)),
        compiler_params=pltpu.CompilerParams(
            dimension_semantics=("parallel",),
            vmem_limit_bytes=VMEM_LIMIT_BYTES,
        ),
    )(xp, rp, g2, b2)
    return out[:rows]


# --------------------------------------------------------------------------
# EncoderBlock forward
# --------------------------------------------------------------------------
def encoder_block_forward(x, mask, params, *, num_heads, eps=1e-5):
    B, S, D = x.shape
    H = num_heads
    dk = D // H
    x2d = x.reshape(B * S, D)

    q = linear(x2d, params["wq"], params["bq"])
    k = linear(x2d, params["wk"], params["bk"])
    v = linear(x2d, params["wv"], params["bv"])

    def split_heads(t):
        return t.reshape(B, S, H, dk).transpose(0, 2, 1, 3).reshape(B * H, S, dk)

    qh, kh, vh = split_heads(q), split_heads(k), split_heads(v)
    mask_f = jnp.broadcast_to(mask.astype(jnp.float32), (B, H, S, S)).reshape(B * H, S, S)

    attn = multi_head_attention(qh, kh, vh, mask_f)
    attn = attn.reshape(B, H, S, dk).transpose(0, 2, 1, 3).reshape(B * S, D)
    attn_out = linear(attn, params["wo"], params["bo"])

    # dropout (eval mode) == identity
    h1 = add_layernorm(x2d, attn_out, params["ln1_g"], params["ln1_b"], eps=eps)

    ff = linear(h1, params["w1"], params["b1"], relu=True)
    ff = linear(ff, params["w2"], params["b2"])

    out2d = add_layernorm(h1, ff, params["ln2_g"], params["ln2_b"], eps=eps)
    return out2d.reshape(B, S, D)


# --------------------------------------------------------------------------
# Pure-JAX reference (matches PyTorch EncoderBlock in eval mode)
# --------------------------------------------------------------------------
def _reference_encoder_block(x, mask, params, *, num_heads, eps=1e-5):
    B, S, D = x.shape
    H, dk = num_heads, D // num_heads

    def lin(t, w, b):
        return jnp.dot(t, w) + b

    def split(t):
        return t.reshape(B, S, H, dk).transpose(0, 2, 1, 3)

    q = split(lin(x, params["wq"], params["bq"]))
    k = split(lin(x, params["wk"], params["bk"]))
    v = split(lin(x, params["wv"], params["bv"]))

    s = jnp.einsum("bhqd,bhkd->bhqk", q, k) * (1.0 / math.sqrt(dk))
    s = jnp.where(mask == 0, -jnp.inf, s)
    p = jax.nn.softmax(s, axis=-1)
    o = jnp.einsum("bhqk,bhkd->bhqd", p, v).transpose(0, 2, 1, 3).reshape(B, S, D)
    attn_out = lin(o, params["wo"], params["bo"])

    def ln(t, g, b):
        mean = jnp.mean(t, axis=-1, keepdims=True)
        var = jnp.mean((t - mean) ** 2, axis=-1, keepdims=True)
        return (t - mean) / jnp.sqrt(var + eps) * g + b

    h1 = ln(x + attn_out, params["ln1_g"], params["ln1_b"])
    ff = jnp.maximum(lin(h1, params["w1"], params["b1"]), 0.0)
    ff = lin(ff, params["w2"], params["b2"])
    return ln(h1 + ff, params["ln2_g"], params["ln2_b"])


if __name__ == "__main__":
    B, S, D, H, DFF = 2, 8, 32, 4, 64

    keys = jax.random.split(jax.random.PRNGKey(0), 16)

    def init(kk, shape, scale=0.1):
        return scale * jax.random.normal(kk, shape, jnp.float32)

    params = {
        "wq": init(keys[0], (D, D)), "bq": init(keys[1], (D,)),
        "wk": init(keys[2], (D, D)), "bk": init(keys[3], (D,)),
        "wv": init(keys[4], (D, D)), "bv": init(keys[5], (D,)),
        "wo": init(keys[6], (D, D)), "bo": init(keys[7], (D,)),
        "w1": init(keys[8], (D, DFF)), "b1": init(keys[9], (DFF,)),
        "w2": init(keys[10], (DFF, D)), "b2": init(keys[11], (D,)),
        "ln1_g": 1.0 + init(keys[12], (D,)),
        "ln1_b": init(keys[13], (D,)),
        "ln2_g": 1.0 + init(keys[14], (D,)),
        "ln2_b": init(keys[15], (D,)),
    }

    x = jax.random.normal(jax.random.PRNGKey(1), (B, S, D), jnp.float32)
    # causal mask (1 = keep, 0 = masked), broadcastable as in the torch module
    mask = jnp.tril(jnp.ones((S, S), jnp.float32)).reshape(1, 1, S, S)

    out = encoder_block_forward(x, mask, params, num_heads=H)
    out = jax.block_until_ready(out)

    ref = _reference_encoder_block(x, mask, params, num_heads=H)
    assert out.shape == x.shape and out.dtype == x.dtype
    assert not bool(jnp.any(jnp.isnan(out))), "NaN in kernel output"
    err = float(jnp.max(jnp.abs(out - ref)))
    assert jnp.allclose(out, ref, atol=1e-4, rtol=1e-4), f"mismatch vs reference: {err}"

    print("KERNEL_OK")
</pallas_src>

<mosaic_0001>
module attributes {stable_mosaic.version = 11 : i64} {
  func.func @_linear_kernel(%arg0: i32, %arg1: i32, %arg2: i32, %arg3: memref<16x128xf32, #tpu.memory_space<vmem>>, %arg4: memref<128x128xf32, #tpu.memory_space<vmem>>, %arg5: memref<1x128xf32, #tpu.memory_space<vmem>>, %arg6: memref<16x128xf32, #tpu.memory_space<vmem>>, %arg7: memref<16x128xf32, #tpu.memory_space<vmem>>) attributes {dimension_semantics = [#tpu.dimension_semantics<parallel>, #tpu.dimension_semantics<parallel>, #tpu.dimension_semantics<arbitrary>], iteration_bounds = array<i64: 1, 1, 1>, scalar_prefetch = 0 : i64, scratch_operands = 1 : i64, tpu.core_type = #tpu.core_type<tc>, window_params = [{transform_indices = @transform_0, window_bounds = array<i64: 16, 128>}, {transform_indices = @transform_1, window_bounds = array<i64: 128, 128>}, {transform_indices = @transform_2, window_bounds = array<i64: 1, 128>}, {transform_indices = @transform_3, window_bounds = array<i64: 16, 128>}]} {
    %c0_i32 = arith.constant 0 : i32
    %0 = arith.cmpi eq, %arg2, %c0_i32 : i32
    %1 = arith.extui %0 : i1 to i32
    %c0_i32_0 = arith.constant 0 : i32
    %2 = arith.cmpi ne, %1, %c0_i32_0 : i32
    scf.if %2 {
      %cst_10 = arith.constant 0.000000e+00 : f32
      %12 = vector.broadcast %cst_10 : f32 to vector<16x128xf32>
      %c0_11 = arith.constant 0 : index
      %c0_12 = arith.constant 0 : index
      %13 = vector.load %arg7[%c0_11, %c0_12] : memref<16x128xf32, #tpu.memory_space<vmem>>, vector<16x128xf32>
      tpu.vector_store %arg7[%c0_11, %c0_12], %12 {strides = array<i32>} : memref<16x128xf32, #tpu.memory_space<vmem>>, vector<16x128xf32>,
    } else {
    }
    %c0 = arith.constant 0 : index
    %c0_1 = arith.constant 0 : index
    %3 = vector.load %arg7[%c0, %c0_1] : memref<16x128xf32, #tpu.memory_space<vmem>>, vector<16x128xf32>
    %c0_2 = arith.constant 0 : index
    %c0_3 = arith.constant 0 : index
    %4 = vector.load %arg3[%c0_2, %c0_3] : memref<16x128xf32, #tpu.memory_space<vmem>>, vector<16x128xf32>
    %c0_4 = arith.constant 0 : index
    %c0_5 = arith.constant 0 : index
    %5 = vector.load %arg4[%c0_4, %c0_5] : memref<128x128xf32, #tpu.memory_space<vmem>>, vector<128x128xf32>
    %cst = arith.constant dense<0.000000e+00> : vector<16x128xf32>
    %6 = tpu.matmul %4, %5, %cst {dimension_numbers = #tpu.dot_dimension_numbers<[1], [0], [0], [1], [0, 0, 1, 1], [], []>} : vector<16x128xf32>, vector<128x128xf32>, vector<16x128xf32> -> vector<16x128xf32>
    %7 = arith.addf %3, %6 : vector<16x128xf32>
    %c0_6 = arith.constant 0 : index
    %c0_7 = arith.constant 0 : index
    %8 = vector.load %arg7[%c0_6, %c0_7] : memref<16x128xf32, #tpu.memory_space<vmem>>, vector<16x128xf32>
    tpu.vector_store %arg7[%c0_6, %c0_7], %7 {strides = array<i32>} : memref<16x128xf32, #tpu.memory_space<vmem>>, vector<16x128xf32>,
    %c0_i32_8 = arith.constant 0 : i32
    %9 = arith.cmpi eq, %arg2, %c0_i32_8 : i32
    %10 = arith.extui %9 : i1 to i32
    %c0_i32_9 = arith.constant 0 : i32
    %11 = arith.cmpi ne, %10, %c0_i32_9 : i32
    scf.if %11 {
      %c0_10 = arith.constant 0 : index
      %c0_11 = arith.constant 0 : index
      %12 = vector.load %arg7[%c0_10, %c0_11] : memref<16x128xf32, #tpu.memory_space<vmem>>, vector<16x128xf32>
      %c0_12 = arith.constant 0 : index
      %c0_13 = arith.constant 0 : index
      %13 = vector.load %arg5[%c0_12, %c0_13] : memref<1x128xf32, #tpu.memory_space<vmem>>, vector<1x128xf32>
      %14 = vector.broadcast %13 : vector<1x128xf32> to vector<16x128xf32>
      %15 = arith.addf %12, %14 : vector<16x128xf32>
      %c0_14 = arith.constant 0 : index
      %c0_15 = arith.constant 0 : index
      %16 = vector.load %arg6[%c0_14, %c0_15] : memref<16x128xf32, #tpu.memory_space<vmem>>, vector<16x128xf32>
      tpu.vector_store %arg6[%c0_14, %c0_15], %15 {strides = array<i32>} : memref<16x128xf32, #tpu.memory_space<vmem>>, vector<16x128xf32>,
    } else {
    }
    return
  }
  func.func @transform_0(%arg0: i32, %arg1: i32, %arg2: i32) -> (i32, i32) {
    %c0_i32 = arith.constant 0 : i32
    return %arg0, %arg2 : i32, i32
  }
  func.func @transform_1(%arg0: i32, %arg1: i32, %arg2: i32) -> (i32, i32) {
    %c0_i32 = arith.constant 0 : i32
    return %arg2, %arg1 : i32, i32
  }
  func.func @transform_2(%arg0: i32, %arg1: i32, %arg2: i32) -> (i32, i32) {
    %c0_i32 = arith.constant 0 : i32
    %c0_i32_0 = arith.constant 0 : i32
    return %c0_i32, %arg1 : i32, i32
  }
  func.func @transform_3(%arg0: i32, %arg1: i32, %arg2: i32) -> (i32, i32) {
    %c0_i32 = arith.constant 0 : i32
    return %arg0, %arg1 : i32, i32
  }
}

</mosaic_0001>

<bundles_post_ra>
// kernel: tpu_custom_call.1
= control target key start
LH: loop header
LB: loop body
LE: loop exit
PB: predicated region body
PF: predicated region fallthrough
CT: control target
= control target key end

     0   :  { %8 = vsyncpa [#allocation4], 0  ;;  %s353_s0 = inlined_call_operand.hbm [shape: f32[16,128], index: 0, kind: input, shape index: {}]   ;;  %s354_s1 = inlined_call_operand.hbm [shape: f32[128,128], index: 1, kind: input, shape index: {}]   ;;  %s355_s2 = inlined_call_operand.vmem [shape: f32[1,128], index: 2, kind: input, shape index: {}]   ;;  %s356_s3 = inlined_call_operand.hbm [shape: f32[16,128], index: 3, kind: output, shape index: {}]  }
   0x1   :  { %9 = vsyncpa [#allocation7], 0 }
   0x2   :  { %10 = vsyncpa [#allocation5], 0  ;;  %s307_s12 = smov [#allocation3]  }
   0x3   :  { %s16_s13 = sshll.u32 %s307_s12, 4  ;;  %s17_s13 = int_to_ptr.vmem [resolvable:$true] %s16_s13 }
   0x4   :  { %s249_s14 = scalar_lea.vmem %s17_s13, 256  ;;  %p254_p1 = scmp.lt.s32.totalorder %s17_s13, %s17_s13 }
   0x5   :  { %p250_p0 = scmp.ne.s32.totalorder %s17_s13, %s249_s14  ;;  %p255_p2 = scmp.lt.s32.totalorder %s249_s14, %s249_s14 }
   0x7   :  { %p256_p3 = por %p255_p2, %p254_p1 }
   0x9   :  { %p257_p4 = pnand %p256_p3, %p250_p0 }
   0xb   :  { %260 = shalt.err (!%p257_p4)
}
   0xc   :  { %s308_s15 = smov 128   ;;  %s309_s16 = smov 8  }
   0xd   :  { %22 = dma.hbm_to_vmem [thread:$0]  %s353_s0, 256, %s17_s13, [#allocation4], %s308_s15, %s308_s15, %s309_s16  }
   0xe   :  { %s310_s19 = smov [#allocation6]  }
   0xf   :  { %s28_s20 = sshll.u32 %s310_s19, 4  ;;  %s29_s20 = int_to_ptr.vmem [resolvable:$true] %s28_s20 }
  0x10   :  { %s269_s21 = scalar_lea.vmem %s29_s20, 2048  ;;  %p274_p6 = scmp.lt.s32.totalorder %s29_s20, %s29_s20 }
  0x11   :  { %p270_p5 = scmp.ne.s32.totalorder %s29_s20, %s269_s21  ;;  %p275_p7 = scmp.lt.s32.totalorder %s269_s21, %s269_s21 }
  0x13   :  { %p276_p8 = por %p275_p7, %p274_p6 }
  0x15   :  { %p277_p9 = pnand %p276_p8, %p270_p5 }
  0x17   :  { %280 = shalt.err (!%p277_p9)
}
  0x18   :  { %34 = dma.hbm_to_vmem [thread:$0]  %s354_s1, 2048, %s29_s20, [#allocation7], %s308_s15, %s308_s15, %s309_s16  }
  0x19   :  { %301 = dma.done.wait [#allocation4], 256  }
  0x1a   :  { %302 = vsyncadd [#allocation4], 4294967040 }
  0x1b   :  { %303 = dma.done.wait [#allocation7], 2048  }
  0x1c   :  { %304 = vsyncadd [#allocation7], 4294965248  ;;  %v68_v0 = vld [vmem:[#allocation6 + $0x78] sm:$0xff]  ;;  %v67_v1 = vld [vmem:[#allocation6 + $0x70] sm:$0xff]  ;;  %s311_s24 = smov [#allocation8]  }
  0x1d   :  { %201 = vmatprep.subr.mxu0 %v68_v0  ;;  %v66_v2 = vld [vmem:[#allocation6 + $0x68] sm:$0xff]  ;;  %v65_v3 = vld [vmem:[#allocation6 + $0x60] sm:$0xff]  ;;  %v51_v4 = vld [vmem:[#allocation3] sm:$0xff]  ;;  %s169_s25 = sshll.u32 %s311_s24, 4  ;;  %s170_s25 = int_to_ptr.vmem [resolvable:$true] %s169_s25 }
  0x1e   :  { %202 = vmatpush3.msra.mxu0 %v68_v0  ;;  %v64_v5 = vld [vmem:[#allocation6 + $0x58] sm:$0xff]  ;;  %233 = vmatprep.mubr.f32.mxu0 %v51_v4  ;;  %v63_v6 = vld [vmem:[#allocation6 + $0x50] sm:$0xff]  ;;  %v62_v7 = vld [vmem:[#allocation6 + $0x48] sm:$0xff]  ;;  %s281_s26 = scalar_lea.vmem %s170_s25, 256  ;;  %p286_p11 = scmp.lt.s32.totalorder %s170_s25, %s170_s25 }
  0x1f   :  { %203 = vmatprep.subr.mxu0 %v67_v1  ;;  %v61_v8 = vld [vmem:[#allocation6 + $0x40] sm:$0xff]  ;;  %v60_v9 = vld [vmem:[#allocation6 + $0x38] sm:$0xff]  ;;  %v59_v10 = vld [vmem:[#allocation6 + $0x30] sm:$0xff]  ;;  %p282_p10 = scmp.ne.s32.totalorder %s170_s25, %s281_s26  ;;  %p287_p12 = scmp.lt.s32.totalorder %s281_s26, %s281_s26 }
  0x20   :  { %204 = vmatpush3.msra.mxu0 %v67_v1  ;;  %v58_v11 = vld [vmem:[#allocation6 + $0x28] sm:$0xff]  ;;  %v57_v12 = vld [vmem:[#allocation6 + $0x20] sm:$0xff]  ;;  %v56_v13 = vld [vmem:[#allocation6 + $0x18] sm:$0xff] }
  0x21   :  { %205 = vmatprep.subr.mxu0 %v66_v2  ;;  %v55_v14 = vld [vmem:[#allocation6 + $0x10] sm:$0xff]  ;;  %v54_v15 = vld [vmem:[#allocation6 + $0x8] sm:$0xff]  ;;  %v53_v16 = vld [vmem:[#allocation6] sm:$0xff]  ;;  %p288_p13 = por %p287_p12, %p286_p11 }
  0x22   :  { %206 = vmatpush3.msra.mxu0 %v66_v2  ;;  %v52_v17 = vld [vmem:[#allocation3 + $0x8] sm:$0xff]  ;;  %v182_v18 = vld [vmem:[%s355_s2] ss:$0 sm:$0xff] }
  0x23   :  { %207 = vmatprep.subr.mxu0 %v65_v3  ;;  %p289_p0 = pnand %p288_p13, %p282_p10 }
  0x24   :  { %208 = vmatpush3.msra.mxu0 %v65_v3 }
  0x25   :  { %209 = vmatprep.subr.mxu0 %v64_v5 }
  0x26   :  { %210 = vmatpush3.msra.mxu0 %v64_v5 }
  0x27   :  { %211 = vmatprep.subr.mxu0 %v63_v6 }
  0x28   :  { %212 = vmatpush3.msra.mxu0 %v63_v6 }
  0x29   :  { %213 = vmatprep.subr.mxu0 %v62_v7 }
  0x2a   :  { %214 = vmatpush3.msra.mxu0 %v62_v7 }
  0x2b   :  { %215 = vmatprep.subr.mxu0 %v61_v8 }
  0x2c   :  { %216 = vmatpush3.msra.mxu0 %v61_v8 }
  0x2d   :  { %217 = vmatprep.subr.mxu0 %v60_v9 }
  0x2e   :  { %218 = vmatpush3.msra.mxu0 %v60_v9 }
  0x2f   :  { %219 = vmatprep.subr.mxu0 %v59_v10 }
  0x30   :  { %220 = vmatpush3.msra.mxu0 %v59_v10 }
  0x31   :  { %221 = vmatprep.subr.mxu0 %v58_v11 }
  0x32   :  { %222 = vmatpush3.msra.mxu0 %v58_v11 }
  0x33   :  { %223 = vmatprep.subr.mxu0 %v57_v12 }
  0x34   :  { %224 = vmatpush3.msra.mxu0 %v57_v12 }
  0x35   :  { %225 = vmatprep.subr.mxu0 %v56_v13 }
  0x36   :  { %226 = vmatpush3.msra.mxu0 %v56_v13 }
  0x37   :  { %227 = vmatprep.subr.mxu0 %v55_v14 }
  0x38   :  { %228 = vmatpush3.msra.mxu0 %v55_v14 }
  0x39   :  { %229 = vmatprep.subr.mxu0 %v54_v15 }
  0x3a   :  { %230 = vmatpush3.msra.mxu0 %v54_v15 }
  0x3b   :  { %231 = vmatprep.subr.mxu0 %v53_v16 }
  0x3c   :  { %232 = vmatpush3.msra.mxu0 %v53_v16 }
  0x3d   :  { %234 = vmatmul.mubr.f32.vlgmr.msra.gmra.mxu0 %v52_v17 }
  0xfd   :  { %v235_v19 = vpop.f32.mrf.mxu0 }
  0xfe   :  { %v161_v20 = vadd.f32 %v235_v19, %v182_v18 }
  0xff   :  { %v135_v21 = vpop.f32.mrf.mxu0 }
 0x100   :  { %163 = vst [vmem:[#allocation8 + $0x8] sm:$0xff] %v161_v20  ;;  %v160_v22 = vadd.f32 %v182_v18, %v135_v21 }
 0x102   :  { %162 = vst [vmem:[#allocation8] sm:$0xff] %v160_v22 }
 0x103   :  { %292 = shalt.err (!%p289_p0)
}
 0x104   :  { %175 = dma.vmem_to_hbm [thread:$0]  %s170_s25, 256, %s356_s3, [#allocation5], %s308_s15, %s308_s15, %s309_s16  }
 0x105   :  { %305 = dma.done.wait [#allocation5], 256  }
 0x106   :  { %306 = vsyncadd [#allocation5], 4294967040 }
 0x107   :  { %179 = vsyncpa [#allocation4], 1 }
 0x108   :  { %180 = vsyncpa [#allocation7], 1 }
 0x109   :  { %181 = vsyncpa [#allocation5], 1 }

</bundles_post_ra>
